<compile_context>
chip_gen: v5e
topology: v5e:2x2
jax: 0.10.0
libtpu: 0.0.40
codegen_flags: <defaults>
</compile_context>

<pallas_src>
import functools
import math

import jax
import jax.numpy as jnp
from jax import lax
from jax.experimental import pallas as pl
from jax.experimental.pallas import tpu as pltpu


def liquid_kernel(x_ref, wt_ref, p_ref, o_ref, slab, u_c, s_c, *, f_out, eps):
    """One (batch-block bb, seq-chunk tt) grid step.

    x_ref : (St, Bt, Fin)  time-major input chunk (Bt=8 batch rows in sublanes)
    wt_ref: (Fin, Fp)      W^T, lane-padded to Fp (multiple of 128)
    p_ref : (5, Fp)        rows: [bias, a=1-dt/tau, c=dt/tau, ln_gamma, ln_beta]
    o_ref : (St, Bt, Fp)   output chunk (lane-dense -> unmasked stores)
    slab  : (St, Bt, Fp)   VMEM scratch; holds I, overwritten in place with s
    u_c   : (Bt, Fp)       persistent u carry across seq chunks
    s_c   : (Bt, Fp)       persistent s carry across seq chunks
    """
    St, Bt, Fin = x_ref.shape
    Fp = o_ref.shape[-1]
    tt = pl.program_id(1)

    # New batch block: restart the recurrence from zero.
    @pl.when(tt == 0)
    def _():
        u_c[...] = jnp.zeros_like(u_c)
        s_c[...] = jnp.zeros_like(s_c)

    bias = p_ref[0:1, :]     # (1, Fp)
    a = p_ref[1:2, :]        # 1 - dt/tau
    c = p_ref[2:3, :]        # dt/tau
    gamma = p_ref[3:4, :]
    beta = p_ref[4:5, :]

    # --- hot path 1: input projection on the MXU for the whole chunk ---------
    x2 = x_ref[...].reshape(St * Bt, Fin)
    i2 = jnp.dot(x2, wt_ref[...], preferred_element_type=jnp.float32)
    slab[...] = i2.reshape(St, Bt, Fp) + bias          # padded lanes stay exactly 0

    # --- hot path 2: serial liquid recurrence, 8 batch rows per step ---------
    #   u' = a*u + c*I ;  s' = a*s + c*u  (old u -> matches the PyTorch loop)
    def step(t, carry):
        u, s = carry                                   # (Bt, Fp) each
        it = slab[t]                                   # (Bt, Fp) unmasked load
        u_new = a * u + c * it
        s_new = a * s + c * u
        slab[t] = s_new                                # overwrite consumed I_t
        return (u_new, s_new)

    unroll = 8 if St % 8 == 0 else (4 if St % 4 == 0 else 1)
    u_f, s_f = lax.fori_loop(0, St, step, (u_c[...], s_c[...]), unroll=unroll)
    u_c[...] = u_f
    s_c[...] = s_f

    # --- hoisted tanh + LayerNorm, vectorized over the whole chunk -----------
    y = jnp.tanh(slab[...])                            # (St, Bt, Fp); pad lanes == 0
    inv_f = 1.0 / f_out
    mean = jnp.sum(y, axis=-1, keepdims=True) * inv_f  # pad lanes contribute 0
    d = y - mean
    if Fp != f_out:                                    # keep pad lanes out of variance
        lane = lax.broadcasted_iota(jnp.int32, (1, 1, Fp), 2)
        d = jnp.where(lane < f_out, d, 0.0)
    var = jnp.sum(d * d, axis=-1, keepdims=True) * inv_f
    o_ref[...] = (d * lax.rsqrt(var + eps) * gamma + beta).astype(o_ref.dtype)


def _round_up(x, m):
    return ((x + m - 1) // m) * m


def _pick_seq_chunk(S, Bt, Fin, Fp, budget_bytes=40 * 1024 * 1024, cap=1024):
    """Largest multiple-of-8 time chunk whose VMEM working set fits the budget."""
    fixed = 4 * (2 * Fin * Fp + 2 * 8 * Fp + 2 * Bt * Fp)   # weight(2x) + params + carries
    per_step = 4 * Bt * (2 * Fin + 3 * Fp)                  # x(2x) + out(2x) + slab
    st = max(8, (budget_bytes - fixed) // per_step)
    st = min(int(st), cap, _round_up(S, 8))
    return max(8, (st // 8) * 8)


def liquid_layer_forward(x, W, b, tau, gamma, beta, *, dt=1.0, eps=1e-5,
                         seq_chunk=None, matmul_dtype=jnp.float32):
    """x: (B, S, Fin) float32  ->  (B, S, Fout) float32."""
    B, S, Fin = x.shape
    Fout = W.shape[0]

    Bt = 8                                   # batch rows per sublane block
    Fp = _round_up(Fout, 128)                # lane-pad features to full vregs
    B_pad = _round_up(B, Bt)

    St = seq_chunk if seq_chunk is not None else _pick_seq_chunk(S, Bt, Fin, Fp)
    St = max(8, _round_up(int(St), 8))
    S_pad = _round_up(S, St)

    # --- wrapper-side prep: zero-pad + time-major transpose -------------------
    # TODO(synk): the (B,S,F)<->(S,B,F) transposes cost one extra HBM pass on x and
    # on the output; they buy fully-aligned (8, Fp) per-timestep loads/stores in the
    # dominant serial recurrence. Fold them into the kernel if it becomes HBM-bound.
    x = x.astype(jnp.float32)
    if (B_pad, S_pad) != (B, S):
        x = jnp.pad(x, ((0, B_pad - B), (0, S_pad - S), (0, 0)))
    xt = jnp.transpose(x, (1, 0, 2)).astype(matmul_dtype)    # (S_pad, B_pad, Fin)

    def pad_row(v):
        return jnp.zeros((Fp,), jnp.float32).at[:Fout].set(v.astype(jnp.float32))

    Wt = jnp.zeros((Fin, Fp), matmul_dtype).at[:, :Fout].set(
        jnp.transpose(W).astype(matmul_dtype))
    c_vec = dt / tau.astype(jnp.float32)
    a_vec = 1.0 - c_vec
    params = jnp.stack([pad_row(b), pad_row(a_vec), pad_row(c_vec),
                        pad_row(gamma), pad_row(beta)], axis=0)   # (5, Fp)

    kernel = functools.partial(liquid_kernel, f_out=int(Fout), eps=float(eps))

    grid = (B_pad // Bt, S_pad // St)

    cost = pl.CostEstimate(
        flops=2 * S_pad * B_pad * Fin * Fp + 12 * S_pad * B_pad * Fp,
        transcendentals=S_pad * B_pad * (Fp + 1),
        bytes_accessed=4 * (S_pad * B_pad * (Fin + Fp) + Fin * Fp + 5 * Fp),
    )

    out_t = pl.pallas_call(
        kernel,
        out_shape=jax.ShapeDtypeStruct((S_pad, B_pad, Fp), jnp.float32),
        grid_spec=pltpu.PrefetchScalarGridSpec(
            num_scalar_prefetch=0,
            grid=grid,
            in_specs=[
                # x (time-major): one 8-row batch block, one sequence chunk.
                pl.BlockSpec((St, Bt, Fin), lambda bb, tt: (tt, bb, 0)),
                pl.BlockSpec((Fin, Fp), lambda bb, tt: (0, 0)),
                pl.BlockSpec((5, Fp), lambda bb, tt: (0, 0)),
            ],
            out_specs=pl.BlockSpec((St, Bt, Fp), lambda bb, tt: (tt, bb, 0)),
            scratch_shapes=[
                pltpu.VMEM((St, Bt, Fp), jnp.float32),   # shared I/s slab (aliased)
                pltpu.VMEM((Bt, Fp), jnp.float32),       # u carry (persists over tt)
                pltpu.VMEM((Bt, Fp), jnp.float32),       # s carry
            ],
        ),
        compiler_params=pltpu.CompilerParams(
            dimension_semantics=("parallel", "arbitrary"),
            vmem_limit_bytes=48 * 1024 * 1024,
        ),
        cost_estimate=cost,
    )(xt, Wt, params)

    # back to (B, S, Fout): undo time-major layout and strip batch/lane padding.
    return jnp.transpose(out_t, (1, 0, 2))[:B, :S, :Fout]


def liquid_layer_reference(x, W, b, tau, gamma, beta, *, dt=1.0, eps=1e-5):
    """Pure-JAX reference mirroring the PyTorch forward."""
    B, S, _ = x.shape
    Fout = W.shape[0]
    I = jnp.einsum("bsi,oi->bso", x, W) + b              # (B, S, Fout)

    def step(carry, It):
        u, s = carry
        du = (-u + It) / tau
        ds = (-s + u) / tau
        u_new = u + du * dt
        s_new = s + ds * dt
        return (u_new, s_new), s_new

    init = (jnp.zeros((B, Fout), jnp.float32), jnp.zeros((B, Fout), jnp.float32))
    _, s_seq = lax.scan(step, init, jnp.transpose(I, (1, 0, 2)))
    y = jnp.tanh(jnp.transpose(s_seq, (1, 0, 2)))        # (B, S, Fout)
    mean = jnp.mean(y, axis=-1, keepdims=True)
    var = jnp.mean((y - mean) ** 2, axis=-1, keepdims=True)
    return (y - mean) / jnp.sqrt(var + eps) * gamma + beta


if __name__ == "__main__":
    # Small shapes consistent with the module's forward.
    batch, seq_len, in_features, out_features = 2, 8, 16, 32
    dt = 1.0

    key = jax.random.PRNGKey(0)
    kx, kw = jax.random.split(key)

    # Deterministic parameter init (mirrors the module's __init__ shapes).
    W = jax.random.normal(kw, (out_features, in_features), jnp.float32) / math.sqrt(in_features)
    b = jnp.zeros((out_features,), jnp.float32)
    tau = jnp.ones((out_features,), jnp.float32)
    gamma = jnp.ones((out_features,), jnp.float32)   # LayerNorm weight
    beta = jnp.zeros((out_features,), jnp.float32)   # LayerNorm bias

    x = jax.random.normal(kx, (batch, seq_len, in_features), jnp.float32)

    out = liquid_layer_forward(x, W, b, tau, gamma, beta, dt=dt)
    out = jax.block_until_ready(out)

    ref = liquid_layer_reference(x, W, b, tau, gamma, beta, dt=dt)
    assert out.shape == (batch, seq_len, out_features)
    # Tolerance covers MXU default-precision differences between the Mosaic dot and
    # the XLA reference einsum for f32 inputs (tighten with Precision.HIGHEST, or
    # pass matmul_dtype=jnp.bfloat16 for the fast path with looser tolerance).
    assert jnp.max(jnp.abs(out - ref)) < 2e-3, "mismatch vs pure-JAX reference"

    print("KERNEL_OK")
</pallas_src>

<mosaic_0001>
module attributes {stable_mosaic.version = 11 : i64} {
  func.func @liquid_kernel(%arg0: i32, %arg1: i32, %arg2: memref<8x8x16xf32, #tpu.memory_space<vmem>>, %arg3: memref<16x128xf32, #tpu.memory_space<vmem>>, %arg4: memref<5x128xf32, #tpu.memory_space<vmem>>, %arg5: memref<8x8x128xf32, #tpu.memory_space<vmem>>, %arg6: memref<8x8x128xf32, #tpu.memory_space<vmem>>, %arg7: memref<8x128xf32, #tpu.memory_space<vmem>>, %arg8: memref<8x128xf32, #tpu.memory_space<vmem>>) attributes {dimension_semantics = [#tpu.dimension_semantics<parallel>, #tpu.dimension_semantics<arbitrary>], iteration_bounds = array<i64: 1, 1>, scalar_prefetch = 0 : i64, scratch_operands = 3 : i64, tpu.core_type = #tpu.core_type<tc>, window_params = [{transform_indices = @transform_0, window_bounds = array<i64: 8, 8, 16>}, {pipeline_mode = #tpu.pipeline_mode<synchronous>, transform_indices = @transform_1, window_bounds = array<i64: 16, 128>}, {pipeline_mode = #tpu.pipeline_mode<synchronous>, transform_indices = @transform_2, window_bounds = array<i64: 5, 128>}, {transform_indices = @transform_3, window_bounds = array<i64: 8, 8, 128>}]} {
    %c0_i32 = arith.constant 0 : i32
    %0 = arith.cmpi eq, %arg1, %c0_i32 : i32
    %1 = arith.extui %0 : i1 to i32
    %c0_i32_0 = arith.constant 0 : i32
    %2 = arith.cmpi ne, %1, %c0_i32_0 : i32
    scf.if %2 {
      %cst_67 = arith.constant 0.000000e+00 : f32
      %189 = vector.broadcast %cst_67 : f32 to vector<8x128xf32>
      %c0_68 = arith.constant 0 : index
      %c0_69 = arith.constant 0 : index
      %190 = vector.load %arg7[%c0_68, %c0_69] : memref<8x128xf32, #tpu.memory_space<vmem>>, vector<8x128xf32>
      tpu.vector_store %arg7[%c0_68, %c0_69], %189 {strides = array<i32>} : memref<8x128xf32, #tpu.memory_space<vmem>>, vector<8x128xf32>,
      %cst_70 = arith.constant 0.000000e+00 : f32
      %191 = vector.broadcast %cst_70 : f32 to vector<8x128xf32>
      %c0_71 = arith.constant 0 : index
      %c0_72 = arith.constant 0 : index
      %192 = vector.load %arg8[%c0_71, %c0_72] : memref<8x128xf32, #tpu.memory_space<vmem>>, vector<8x128xf32>
      tpu.vector_store %arg8[%c0_71, %c0_72], %191 {strides = array<i32>} : memref<8x128xf32, #tpu.memory_space<vmem>>, vector<8x128xf32>,
    } else {
    }
    %c0 = arith.constant 0 : index
    %c0_1 = arith.constant 0 : index
    %3 = vector.load %arg4[%c0, %c0_1] : memref<5x128xf32, #tpu.memory_space<vmem>>, vector<1x128xf32>
    %c1 = arith.constant 1 : index
    %c0_2 = arith.constant 0 : index
    %4 = vector.load %arg4[%c1, %c0_2] : memref<5x128xf32, #tpu.memory_space<vmem>>, vector<1x128xf32>
    %c2 = arith.constant 2 : index
    %c0_3 = arith.constant 0 : index
    %5 = vector.load %arg4[%c2, %c0_3] : memref<5x128xf32, #tpu.memory_space<vmem>>, vector<1x128xf32>
    %c3 = arith.constant 3 : index
    %c0_4 = arith.constant 0 : index
    %6 = vector.load %arg4[%c3, %c0_4] : memref<5x128xf32, #tpu.memory_space<vmem>>, vector<1x128xf32>
    %c4 = arith.constant 4 : index
    %c0_5 = arith.constant 0 : index
    %7 = vector.load %arg4[%c4, %c0_5] : memref<5x128xf32, #tpu.memory_space<vmem>>, vector<1x128xf32>
    %c0_6 = arith.constant 0 : index
    %c0_7 = arith.constant 0 : index
    %c0_8 = arith.constant 0 : index
    %8 = vector.load %arg2[%c0_6, %c0_7, %c0_8] : memref<8x8x16xf32, #tpu.memory_space<vmem>>, vector<8x8x16xf32>
    %9 = vector.shape_cast %8 : vector<8x8x16xf32> to vector<64x16xf32>
    %c0_9 = arith.constant 0 : index
    %c0_10 = arith.constant 0 : index
    %10 = vector.load %arg3[%c0_9, %c0_10] : memref<16x128xf32, #tpu.memory_space<vmem>>, vector<16x128xf32>
    %cst = arith.constant dense<0.000000e+00> : vector<64x128xf32>
    %11 = tpu.matmul %9, %10, %cst {dimension_numbers = #tpu.dot_dimension_numbers<[1], [0], [0], [1], [0, 0, 1, 1], [], []>} : vector<64x16xf32>, vector<16x128xf32>, vector<64x128xf32> -> vector<64x128xf32>
    %12 = vector.shape_cast %11 : vector<64x128xf32> to vector<8x8x128xf32>
    %13 = vector.shape_cast %3 : vector<1x128xf32> to vector<1x1x128xf32>
    %14 = vector.broadcast %13 : vector<1x1x128xf32> to vector<8x8x128xf32>
    %15 = arith.addf %12, %14 : vector<8x8x128xf32>
    %c0_11 = arith.constant 0 : index
    %c0_12 = arith.constant 0 : index
    %c0_13 = arith.constant 0 : index
    %16 = vector.load %arg6[%c0_11, %c0_12, %c0_13] : memref<8x8x128xf32, #tpu.memory_space<vmem>>, vector<8x8x128xf32>
    tpu.vector_store %arg6[%c0_11, %c0_12, %c0_13], %15 {strides = array<i32>} : memref<8x8x128xf32, #tpu.memory_space<vmem>>, vector<8x8x128xf32>,
    %c0_14 = arith.constant 0 : index
    %c0_15 = arith.constant 0 : index
    %17 = vector.load %arg7[%c0_14, %c0_15] : memref<8x128xf32, #tpu.memory_space<vmem>>, vector<8x128xf32>
    %c0_16 = arith.constant 0 : index
    %c0_17 = arith.constant 0 : index
    %18 = vector.load %arg8[%c0_16, %c0_17] : memref<8x128xf32, #tpu.memory_space<vmem>>, vector<8x128xf32>
    %c0_i32_18 = arith.constant 0 : i32
    %19 = arith.index_cast %c0_i32_18 : i32 to index
    %c0_19 = arith.constant 0 : index
    %c0_20 = arith.constant 0 : index
    %20 = vector.load %arg6[%19, %c0_19, %c0_20] : memref<8x8x128xf32, #tpu.memory_space<vmem>>, vector<1x8x128xf32>
    %21 = vector.shape_cast %20 : vector<1x8x128xf32> to vector<8x128xf32>
    %22 = vector.broadcast %4 : vector<1x128xf32> to vector<8x128xf32>
    %23 = arith.mulf %22, %17 : vector<8x128xf32>
    %24 = vector.broadcast %5 : vector<1x128xf32> to vector<8x128xf32>
    %25 = arith.mulf %24, %21 : vector<8x128xf32>
    %26 = arith.addf %23, %25 : vector<8x128xf32>
    %27 = vector.broadcast %4 : vector<1x128xf32> to vector<8x128xf32>
    %28 = arith.mulf %27, %18 : vector<8x128xf32>
    %29 = vector.broadcast %5 : vector<1x128xf32> to vector<8x128xf32>
    %30 = arith.mulf %29, %17 : vector<8x128xf32>
    %31 = arith.addf %28, %30 : vector<8x128xf32>
    %32 = arith.index_cast %c0_i32_18 : i32 to index
    %c0_21 = arith.constant 0 : index
    %c0_22 = arith.constant 0 : index
    %33 = vector.load %arg6[%32, %c0_21, %c0_22] : memref<8x8x128xf32, #tpu.memory_space<vmem>>, vector<1x8x128xf32>
    %34 = vector.shape_cast %33 : vector<1x8x128xf32> to vector<8x128xf32>
    %35 = vector.shape_cast %31 : vector<8x128xf32> to vector<1x8x128xf32>
    tpu.vector_store %arg6[%32, %c0_21, %c0_22], %35 {strides = array<i32>} : memref<8x8x128xf32, #tpu.memory_space<vmem>>, vector<1x8x128xf32>,
    %c1_i32 = arith.constant 1 : i32
    %36 = arith.index_cast %c1_i32 : i32 to index
    %c0_23 = arith.constant 0 : index
    %c0_24 = arith.constant 0 : index
    %37 = vector.load %arg6[%36, %c0_23, %c0_24] : memref<8x8x128xf32, #tpu.memory_space<vmem>>, vector<1x8x128xf32>
    %38 = vector.shape_cast %37 : vector<1x8x128xf32> to vector<8x128xf32>
    %39 = vector.broadcast %4 : vector<1x128xf32> to vector<8x128xf32>
    %40 = arith.mulf %39, %26 : vector<8x128xf32>
    %41 = vector.broadcast %5 : vector<1x128xf32> to vector<8x128xf32>
    %42 = arith.mulf %41, %38 : vector<8x128xf32>
    %43 = arith.addf %40, %42 : vector<8x128xf32>
    %44 = vector.broadcast %4 : vector<1x128xf32> to vector<8x128xf32>
    %45 = arith.mulf %44, %31 : vector<8x128xf32>
    %46 = vector.broadcast %5 : vector<1x128xf32> to vector<8x128xf32>
    %47 = arith.mulf %46, %26 : vector<8x128xf32>
    %48 = arith.addf %45, %47 : vector<8x128xf32>
    %49 = arith.index_cast %c1_i32 : i32 to index
    %c0_25 = arith.constant 0 : index
    %c0_26 = arith.constant 0 : index
    %50 = vector.load %arg6[%49, %c0_25, %c0_26] : memref<8x8x128xf32, #tpu.memory_space<vmem>>, vector<1x8x128xf32>
    %51 = vector.shape_cast %50 : vector<1x8x128xf32> to vector<8x128xf32>
    %52 = vector.shape_cast %48 : vector<8x128xf32> to vector<1x8x128xf32>
    tpu.vector_store %arg6[%49, %c0_25, %c0_26], %52 {strides = array<i32>} : memref<8x8x128xf32, #tpu.memory_space<vmem>>, vector<1x8x128xf32>,
    %c2_i32 = arith.constant 2 : i32
    %53 = arith.index_cast %c2_i32 : i32 to index
    %c0_27 = arith.constant 0 : index
    %c0_28 = arith.constant 0 : index
    %54 = vector.load %arg6[%53, %c0_27, %c0_28] : memref<8x8x128xf32, #tpu.memory_space<vmem>>, vector<1x8x128xf32>
    %55 = vector.shape_cast %54 : vector<1x8x128xf32> to vector<8x128xf32>
    %56 = vector.broadcast %4 : vector<1x128xf32> to vector<8x128xf32>
    %57 = arith.mulf %56, %43 : vector<8x128xf32>
    %58 = vector.broadcast %5 : vector<1x128xf32> to vector<8x128xf32>
    %59 = arith.mulf %58, %55 : vector<8x128xf32>
    %60 = arith.addf %57, %59 : vector<8x128xf32>
    %61 = vector.broadcast %4 : vector<1x128xf32> to vector<8x128xf32>
    %62 = arith.mulf %61, %48 : vector<8x128xf32>
    %63 = vector.broadcast %5 : vector<1x128xf32> to vector<8x128xf32>
    %64 = arith.mulf %63, %43 : vector<8x128xf32>
    %65 = arith.addf %62, %64 : vector<8x128xf32>
    %66 = arith.index_cast %c2_i32 : i32 to index
    %c0_29 = arith.constant 0 : index
    %c0_30 = arith.constant 0 : index
    %67 = vector.load %arg6[%66, %c0_29, %c0_30] : memref<8x8x128xf32, #tpu.memory_space<vmem>>, vector<1x8x128xf32>
    %68 = vector.shape_cast %67 : vector<1x8x128xf32> to vector<8x128xf32>
    %69 = vector.shape_cast %65 : vector<8x128xf32> to vector<1x8x128xf32>
    tpu.vector_store %arg6[%66, %c0_29, %c0_30], %69 {strides = array<i32>} : memref<8x8x128xf32, #tpu.memory_space<vmem>>, vector<1x8x128xf32>,
    %c3_i32 = arith.constant 3 : i32
    %70 = arith.index_cast %c3_i32 : i32 to index
    %c0_31 = arith.constant 0 : index
    %c0_32 = arith.constant 0 : index
    %71 = vector.load %arg6[%70, %c0_31, %c0_32] : memref<8x8x128xf32, #tpu.memory_space<vmem>>, vector<1x8x128xf32>
    %72 = vector.shape_cast %71 : vector<1x8x128xf32> to vector<8x128xf32>
    %73 = vector.broadcast %4 : vector<1x128xf32> to vector<8x128xf32>
    %74 = arith.mulf %73, %60 : vector<8x128xf32>
    %75 = vector.broadcast %5 : vector<1x128xf32> to vector<8x128xf32>
    %76 = arith.mulf %75, %72 : vector<8x128xf32>
    %77 = arith.addf %74, %76 : vector<8x128xf32>
    %78 = vector.broadcast %4 : vector<1x128xf32> to vector<8x128xf32>
    %79 = arith.mulf %78, %65 : vector<8x128xf32>
    %80 = vector.broadcast %5 : vector<1x128xf32> to vector<8x128xf32>
    %81 = arith.mulf %80, %60 : vector<8x128xf32>
    %82 = arith.addf %79, %81 : vector<8x128xf32>
    %83 = arith.index_cast %c3_i32 : i32 to index
    %c0_33 = arith.constant 0 : index
    %c0_34 = arith.constant 0 : index
    %84 = vector.load %arg6[%83, %c0_33, %c0_34] : memref<8x8x128xf32, #tpu.memory_space<vmem>>, vector<1x8x128xf32>
    %85 = vector.shape_cast %84 : vector<1x8x128xf32> to vector<8x128xf32>
    %86 = vector.shape_cast %82 : vector<8x128xf32> to vector<1x8x128xf32>
    tpu.vector_store %arg6[%83, %c0_33, %c0_34], %86 {strides = array<i32>} : memref<8x8x128xf32, #tpu.memory_space<vmem>>, vector<1x8x128xf32>,
    %c4_i32 = arith.constant 4 : i32
    %87 = arith.index_cast %c4_i32 : i32 to index
    %c0_35 = arith.constant 0 : index
    %c0_36 = arith.constant 0 : index
    %88 = vector.load %arg6[%87, %c0_35, %c0_36] : memref<8x8x128xf32, #tpu.memory_space<vmem>>, vector<1x8x128xf32>
    %89 = vector.shape_cast %88 : vector<1x8x128xf32> to vector<8x128xf32>
    %90 = vector.broadcast %4 : vector<1x128xf32> to vector<8x128xf32>
    %91 = arith.mulf %90, %77 : vector<8x128xf32>
    %92 = vector.broadcast %5 : vector<1x128xf32> to vector<8x128xf32>
    %93 = arith.mulf %92, %89 : vector<8x128xf32>
    %94 = arith.addf %91, %93 : vector<8x128xf32>
    %95 = vector.broadcast %4 : vector<1x128xf32> to vector<8x128xf32>
    %96 = arith.mulf %95, %82 : vector<8x128xf32>
    %97 = vector.broadcast %5 : vector<1x128xf32> to vector<8x128xf32>
    %98 = arith.mulf %97, %77 : vector<8x128xf32>
    %99 = arith.addf %96, %98 : vector<8x128xf32>
    %100 = arith.index_cast %c4_i32 : i32 to index
    %c0_37 = arith.constant 0 : index
    %c0_38 = arith.constant 0 : index
    %101 = vector.load %arg6[%100, %c0_37, %c0_38] : memref<8x8x128xf32, #tpu.memory_space<vmem>>, vector<1x8x128xf32>
    %102 = vector.shape_cast %101 : vector<1x8x128xf32> to vector<8x128xf32>
    %103 = vector.shape_cast %99 : vector<8x128xf32> to vector<1x8x128xf32>
    tpu.vector_store %arg6[%100, %c0_37, %c0_38], %103 {strides = array<i32>} : memref<8x8x128xf32, #tpu.memory_space<vmem>>, vector<1x8x128xf32>,
    %c5_i32 = arith.constant 5 : i32
    %104 = arith.index_cast %c5_i32 : i32 to index
    %c0_39 = arith.constant 0 : index
    %c0_40 = arith.constant 0 : index
    %105 = vector.load %arg6[%104, %c0_39, %c0_40] : memref<8x8x128xf32, #tpu.memory_space<vmem>>, vector<1x8x128xf32>
    %106 = vector.shape_cast %105 : vector<1x8x128xf32> to vector<8x128xf32>
    %107 = vector.broadcast %4 : vector<1x128xf32> to vector<8x128xf32>
    %108 = arith.mulf %107, %94 : vector<8x128xf32>
    %109 = vector.broadcast %5 : vector<1x128xf32> to vector<8x128xf32>
    %110 = arith.mulf %109, %106 : vector<8x128xf32>
    %111 = arith.addf %108, %110 : vector<8x128xf32>
    %112 = vector.broadcast %4 : vector<1x128xf32> to vector<8x128xf32>
    %113 = arith.mulf %112, %99 : vector<8x128xf32>
    %114 = vector.broadcast %5 : vector<1x128xf32> to vector<8x128xf32>
    %115 = arith.mulf %114, %94 : vector<8x128xf32>
    %116 = arith.addf %113, %115 : vector<8x128xf32>
    %117 = arith.index_cast %c5_i32 : i32 to index
    %c0_41 = arith.constant 0 : index
    %c0_42 = arith.constant 0 : index
    %118 = vector.load %arg6[%117, %c0_41, %c0_42] : memref<8x8x128xf32, #tpu.memory_space<vmem>>, vector<1x8x128xf32>
    %119 = vector.shape_cast %118 : vector<1x8x128xf32> to vector<8x128xf32>
    %120 = vector.shape_cast %116 : vector<8x128xf32> to vector<1x8x128xf32>
    tpu.vector_store %arg6[%117, %c0_41, %c0_42], %120 {strides = array<i32>} : memref<8x8x128xf32, #tpu.memory_space<vmem>>, vector<1x8x128xf32>,
    %c6_i32 = arith.constant 6 : i32
    %121 = arith.index_cast %c6_i32 : i32 to index
    %c0_43 = arith.constant 0 : index
    %c0_44 = arith.constant 0 : index
    %122 = vector.load %arg6[%121, %c0_43, %c0_44] : memref<8x8x128xf32, #tpu.memory_space<vmem>>, vector<1x8x128xf32>
    %123 = vector.shape_cast %122 : vector<1x8x128xf32> to vector<8x128xf32>
    %124 = vector.broadcast %4 : vector<1x128xf32> to vector<8x128xf32>
    %125 = arith.mulf %124, %111 : vector<8x128xf32>
    %126 = vector.broadcast %5 : vector<1x128xf32> to vector<8x128xf32>
    %127 = arith.mulf %126, %123 : vector<8x128xf32>
    %128 = arith.addf %125, %127 : vector<8x128xf32>
    %129 = vector.broadcast %4 : vector<1x128xf32> to vector<8x128xf32>
    %130 = arith.mulf %129, %116 : vector<8x128xf32>
    %131 = vector.broadcast %5 : vector<1x128xf32> to vector<8x128xf32>
    %132 = arith.mulf %131, %111 : vector<8x128xf32>
    %133 = arith.addf %130, %132 : vector<8x128xf32>
    %134 = arith.index_cast %c6_i32 : i32 to index
    %c0_45 = arith.constant 0 : index
    %c0_46 = arith.constant 0 : index
    %135 = vector.load %arg6[%134, %c0_45, %c0_46] : memref<8x8x128xf32, #tpu.memory_space<vmem>>, vector<1x8x128xf32>
    %136 = vector.shape_cast %135 : vector<1x8x128xf32> to vector<8x128xf32>
    %137 = vector.shape_cast %133 : vector<8x128xf32> to vector<1x8x128xf32>
    tpu.vector_store %arg6[%134, %c0_45, %c0_46], %137 {strides = array<i32>} : memref<8x8x128xf32, #tpu.memory_space<vmem>>, vector<1x8x128xf32>,
    %c7_i32 = arith.constant 7 : i32
    %138 = arith.index_cast %c7_i32 : i32 to index
    %c0_47 = arith.constant 0 : index
    %c0_48 = arith.constant 0 : index
    %139 = vector.load %arg6[%138, %c0_47, %c0_48] : memref<8x8x128xf32, #tpu.memory_space<vmem>>, vector<1x8x128xf32>
    %140 = vector.shape_cast %139 : vector<1x8x128xf32> to vector<8x128xf32>
    %141 = vector.broadcast %4 : vector<1x128xf32> to vector<8x128xf32>
    %142 = arith.mulf %141, %128 : vector<8x128xf32>
    %143 = vector.broadcast %5 : vector<1x128xf32> to vector<8x128xf32>
    %144 = arith.mulf %143, %140 : vector<8x128xf32>
    %145 = arith.addf %142, %144 : vector<8x128xf32>
    %146 = vector.broadcast %4 : vector<1x128xf32> to vector<8x128xf32>
    %147 = arith.mulf %146, %133 : vector<8x128xf32>
    %148 = vector.broadcast %5 : vector<1x128xf32> to vector<8x128xf32>
    %149 = arith.mulf %148, %128 : vector<8x128xf32>
    %150 = arith.addf %147, %149 : vector<8x128xf32>
    %151 = arith.index_cast %c7_i32 : i32 to index
    %c0_49 = arith.constant 0 : index
    %c0_50 = arith.constant 0 : index
    %152 = vector.load %arg6[%151, %c0_49, %c0_50] : memref<8x8x128xf32, #tpu.memory_space<vmem>>, vector<1x8x128xf32>
    %153 = vector.shape_cast %152 : vector<1x8x128xf32> to vector<8x128xf32>
    %154 = vector.shape_cast %150 : vector<8x128xf32> to vector<1x8x128xf32>
    tpu.vector_store %arg6[%151, %c0_49, %c0_50], %154 {strides = array<i32>} : memref<8x8x128xf32, #tpu.memory_space<vmem>>, vector<1x8x128xf32>,
    %c8_i32 = arith.constant 8 : i32
    %c0_51 = arith.constant 0 : index
    %c0_52 = arith.constant 0 : index
    %155 = vector.load %arg7[%c0_51, %c0_52] : memref<8x128xf32, #tpu.memory_space<vmem>>, vector<8x128xf32>
    tpu.vector_store %arg7[%c0_51, %c0_52], %145 {strides = array<i32>} : memref<8x128xf32, #tpu.memory_space<vmem>>, vector<8x128xf32>,
    %c0_53 = arith.constant 0 : index
    %c0_54 = arith.constant 0 : index
    %156 = vector.load %arg8[%c0_53, %c0_54] : memref<8x128xf32, #tpu.memory_space<vmem>>, vector<8x128xf32>
    tpu.vector_store %arg8[%c0_53, %c0_54], %150 {strides = array<i32>} : memref<8x128xf32, #tpu.memory_space<vmem>>, vector<8x128xf32>,
    %c0_55 = arith.constant 0 : index
    %c0_56 = arith.constant 0 : index
    %c0_57 = arith.constant 0 : index
    %157 = vector.load %arg6[%c0_55, %c0_56, %c0_57] : memref<8x8x128xf32, #tpu.memory_space<vmem>>, vector<8x8x128xf32>
    %158 = math.tanh %157 : vector<8x8x128xf32>
    %cst_58 = arith.constant dense<0.000000e+00> : vector<8x8xf32>
    %159 = vector.multi_reduction <add>, %158, %cst_58 [2] : vector<8x8x128xf32> to vector<8x8xf32>
    %160 = vector.shape_cast %159 : vector<8x8xf32> to vector<8x8x1xf32>
    %cst_59 = arith.constant 3.125000e-02 : f32
    %161 = vector.broadcast %cst_59 : f32 to vector<8x8x1xf32>
    %162 = arith.mulf %160, %161 : vector<8x8x1xf32>
    %163 = vector.broadcast %162 : vector<8x8x1xf32> to vector<8x8x128xf32>
    %164 = arith.subf %158, %163 : vector<8x8x128xf32>
    %165 = tpu.iota {dimensions = array<i32: 2>} : vector<1x1x128xi32>
    %c32_i32 = arith.constant 32 : i32
    %166 = vector.broadcast %c32_i32 : i32 to vector<1x1x128xi32>
    %167 = arith.cmpi slt, %165, %166 : vector<1x1x128xi32>
    %cst_60 = arith.constant 0.000000e+00 : f32
    %168 = vector.shape_cast %167 : vector<1x1x128xi1> to vector<1x1x128xi1>
    %169 = vector.broadcast %168 : vector<1x1x128xi1> to vector<8x8x128xi1>
    %170 = vector.broadcast %cst_60 : f32 to vector<8x8x128xf32>
    %171 = arith.select %169, %164, %170 : vector<8x8x128xi1>, vector<8x8x128xf32>
    %172 = arith.mulf %171, %171 : vector<8x8x128xf32>
    %cst_61 = arith.constant dense<0.000000e+00> : vector<8x8xf32>
    %173 = vector.multi_reduction <add>, %172, %cst_61 [2] : vector<8x8x128xf32> to vector<8x8xf32>
    %174 = vector.shape_cast %173 : vector<8x8xf32> to vector<8x8x1xf32>
    %cst_62 = arith.constant 3.125000e-02 : f32
    %175 = vector.broadcast %cst_62 : f32 to vector<8x8x1xf32>
    %176 = arith.mulf %174, %175 : vector<8x8x1xf32>
    %cst_63 = arith.constant 9.99999974E-6 : f32
    %177 = vector.broadcast %cst_63 : f32 to vector<8x8x1xf32>
    %178 = arith.addf %176, %177 : vector<8x8x1xf32>
    %179 = math.rsqrt %178 : vector<8x8x1xf32>
    %180 = vector.broadcast %179 : vector<8x8x1xf32> to vector<8x8x128xf32>
    %181 = arith.mulf %171, %180 : vector<8x8x128xf32>
    %182 = vector.shape_cast %6 : vector<1x128xf32> to vector<1x1x128xf32>
    %183 = vector.broadcast %182 : vector<1x1x128xf32> to vector<8x8x128xf32>
    %184 = arith.mulf %181, %183 : vector<8x8x128xf32>
    %185 = vector.shape_cast %7 : vector<1x128xf32> to vector<1x1x128xf32>
    %186 = vector.broadcast %185 : vector<1x1x128xf32> to vector<8x8x128xf32>
    %187 = arith.addf %184, %186 : vector<8x8x128xf32>
    %c0_64 = arith.constant 0 : index
    %c0_65 = arith.constant 0 : index
    %c0_66 = arith.constant 0 : index
    %188 = vector.load %arg5[%c0_64, %c0_65, %c0_66] : memref<8x8x128xf32, #tpu.memory_space<vmem>>, vector<8x8x128xf32>
    tpu.vector_store %arg5[%c0_64, %c0_65, %c0_66], %187 {strides = array<i32>} : memref<8x8x128xf32, #tpu.memory_space<vmem>>, vector<8x8x128xf32>,
    return
  }
  func.func @transform_0(%arg0: i32, %arg1: i32) -> (i32, i32, i32) {
    %c0_i32 = arith.constant 0 : i32
    %c0_i32_0 = arith.constant 0 : i32
    return %arg1, %arg0, %c0_i32 : i32, i32, i32
  }
  func.func @transform_1(%arg0: i32, %arg1: i32) -> (i32, i32) {
    %c0_i32 = arith.constant 0 : i32
    %c0_i32_0 = arith.constant 0 : i32
    %c0_i32_1 = arith.constant 0 : i32
    return %c0_i32, %c0_i32_0 : i32, i32
  }
  func.func @transform_2(%arg0: i32, %arg1: i32) -> (i32, i32) {
    %c0_i32 = arith.constant 0 : i32
    %c0_i32_0 = arith.constant 0 : i32
    %c0_i32_1 = arith.constant 0 : i32
    return %c0_i32, %c0_i32_0 : i32, i32
  }
  func.func @transform_3(%arg0: i32, %arg1: i32) -> (i32, i32, i32) {
    %c0_i32 = arith.constant 0 : i32
    %c0_i32_0 = arith.constant 0 : i32
    return %arg1, %arg0, %c0_i32 : i32, i32, i32
  }
}

</mosaic_0001>

<bundles_post_ra>
// kernel: tpu_custom_call.1
= control target key start
LH: loop header
LB: loop body
LE: loop exit
PB: predicated region body
PF: predicated region fallthrough
CT: control target
= control target key end

     0   :  { %8 = vsyncpa [#allocation6], 0  ;;  %s804_s0 = inlined_call_operand.hbm [shape: f32[8,8,16], index: 0, kind: input, shape index: {}]   ;;  %s805_s1 = inlined_call_operand.hbm [shape: f32[16,128], index: 1, kind: input, shape index: {}]   ;;  %s806_s2 = inlined_call_operand.hbm [shape: f32[5,128], index: 2, kind: input, shape index: {}]   ;;  %s807_s3 = inlined_call_operand.hbm [shape: f32[8,8,128], index: 3, kind: output, shape index: {}]  }
   0x1   :  { %9 = vsyncpa [#allocation9], 0 }
   0x2   :  { %10 = vsyncpa [#allocation7], 0  ;;  %s28_s14 = sshll.u32 %s805_s1, 4  ;;  %s635_s15 = smov [#allocation8]   ;;  %s29_s14 = int_to_ptr.hbm [resolvable:$true] %s28_s14 }
   0x3   :  { %s30_s16 = sshll.u32 %s635_s15, 4  ;;  %s15_s19 = sshll.u32 %s804_s0, 4  ;;  %s31_s16 = int_to_ptr.vmem [resolvable:$true] %s30_s16  ;;  %s16_s19 = int_to_ptr.hbm [resolvable:$true] %s15_s19 }
   0x4   :  { %s636_s20 = smov 128   ;;  %s637_s21 = smov 8  }
   0x5   :  { %36 = dma.hbm_to_vmem [thread:$0]  %s29_s14, 256, %s31_s16, [#allocation9], %s636_s20, %s636_s20, %s637_s21  }
   0x6   :  { %s638_s22 = smov [#allocation5]   ;;  %s42_s1 = sshll.u32 %s806_s2, 4  ;;  %s43_s1 = int_to_ptr.hbm [resolvable:$true] %s42_s1 }
   0x7   :  { %s17_s23 = sshll.u32 %s638_s22, 4  ;;  %s639_s0 = smov [#allocation10]   ;;  %s18_s23 = int_to_ptr.vmem [resolvable:$true] %s17_s23 }
   0x8   :  { %23 = dma.hbm_to_vmem [thread:$0]  %s16_s19, 1024, %s18_s23, [#allocation6], %s636_s20, %s636_s20, %s637_s21  }
   0x9   :  { %s44_s26 = sshll.u32 %s639_s0, 4  ;;  %s45_s26 = int_to_ptr.vmem [resolvable:$true] %s44_s26 }
   0xa   :  { %47 = dma.hbm_to_vmem [thread:$0]  %s43_s1, 128, %s45_s26, [#allocation9]  }
   0xb   :  { %629 = dma.done.wait [#allocation6], 1024  }
   0xc   :  { %630 = vsyncadd [#allocation6], 4294966272 }
   0xd   :  { %631 = dma.done.wait [#allocation9], 384  }
   0xe   :  { %632 = vsyncadd [#allocation9], 4294966912  ;;  %v80_v0 = vld [vmem:[#allocation8 + $0x8] sm:$0xff]  ;;  %v79_v1 = vld [vmem:[#allocation8] sm:$0xff]  ;;  %vm81_vm0 = vcmask 130048   ;;  %s640_s2 = smov [#allocation11]  }
   0xf   :  { %120 = vmatpush.msra.mxu0 %v80_v0  ;;  %v71_v2 = vld [vmem:[#allocation5] sm:$0xff]  ;;  %484 = vmatpush.msra.mxu1 %v80_v0  ;;  %v73_v3 = vld [vmem:[#allocation5 + $0x10] sm:$0xff]  ;;  %v72_v11 = vld [vmem:[#allocation5 + $0x8] sm:$0xff]  ;;  %s460_s27 = sshll.u32 %s640_s2, 4  ;;  %s462_s30 = sshll.u32 %s807_s3, 4  ;;  %s461_s27 = int_to_ptr.vmem [resolvable:$true] %s460_s27  ;;  %s463_s30 = int_to_ptr.hbm [resolvable:$true] %s462_s30 }
  0x10   :  { %485 = vmatpush.msra.mxu2 %v80_v0  ;;  %v75_v4 = vld [vmem:[#allocation5 + $0x20] sm:$0xff]  ;;  %486 = vmatpush.msra.mxu3 %v80_v0  ;;  %v77_v5 = vld [vmem:[#allocation5 + $0x30] sm:$0xff]  ;;  %v74_v12 = vld [vmem:[#allocation5 + $0x18] sm:$0xff] }
  0x11   :  { %121 = vmatpush.msra.mxu0 %v79_v1  ;;  %487 = vmatpush.msra.mxu1 %v79_v1  ;;  %v676_v6 = vld [vmem:[#allocation10 + $0x1] ss:$0 sm:$0xff]  ;;  %v680_v7 = vld [vmem:[#allocation10 + $0x2] ss:$0 sm:$0xff]  ;;  %v76_v13 = vld [vmem:[#allocation5 + $0x28] sm:$0xff] }
  0x12   :  { %476 = vmatmul.msk.f32.vlgmr.msra.gmra.mxu0 %vm81_vm0, %v71_v2  ;;  %478 = vmatmul.msk.f32.vlgmr.msra.gmra.mxu1 %vm81_vm0, %v73_v3  ;;  %v168_v8 = vmul.f32 0.0, %v676_v6  ;;  %v173_v9 = vmul.f32 0.0, %v680_v7  ;;  %v498_v15 = vld [vmem:[#allocation10] ss:$0 sm:$0xff] }
  0x13   :  { %488 = vmatpush.msra.mxu2 %v79_v1  ;;  %489 = vmatpush.msra.mxu3 %v79_v1 }
  0x14   :  { %480 = vmatmul.msk.f32.vlgmr.msra.gmra.mxu2 %vm81_vm0, %v75_v4  ;;  %482 = vmatmul.msk.f32.vlgmr.msra.gmra.mxu3 %vm81_vm0, %v77_v5  ;;  %v174_v10 = vadd.f32 %v173_v9, %v168_v8 }
  0x16   :  { %501 = vtanh.f32 %v174_v10  ;;  %v181_v21 = vmul.f32 %v676_v6, %v174_v10 }
  0x1a   :  { %477 = vmatmul.msk.f32.gmra.mxu0 %vm81_vm0, %v72_v11  ;;  %479 = vmatmul.msk.f32.gmra.mxu1 %vm81_vm0, %v74_v12 }
  0x1c   :  { %481 = vmatmul.msk.f32.gmra.mxu2 %vm81_vm0, %v76_v13  ;;  %v689_v14 = vpop.eup %501 }
  0x1d   :  { %257 = vadd.xlane.f32.xlu0 %v689_v14 }
  0x8f   :  { %v123_v16 = vpop.f32.mrf.mxu0  ;;  %v129_v17 = vpop.f32.mrf.mxu1 }
  0x90   :  { %v148_v18 = vadd.f32 %v498_v15, %v123_v16  ;;  %v150_v30 = vadd.f32 %v498_v15, %v129_v17  ;;  %v258_v5 = vpop.xlane.xlu0 %257 }
  0x91   :  { %v273_v13 = vmul.f32 0.03125, %v258_v5 }
  0x92   :  { %v170_v19 = vmul.f32 %v680_v7, %v148_v18  ;;  %v188_v35 = vmul.f32 %v680_v7, %v150_v30 }
  0x93   :  { %v281_v18 = vsub.f32 %v689_v14, %v273_v13 }
  0x94   :  { %v171_v20 = vadd.f32 %v170_v19, %v168_v8  ;;  %v289_v8 = vlaneseq }
  0x96   :  { %v182_v22 = vmul.f32 %v680_v7, %v171_v20  ;;  %v178_v28 = vmul.f32 %v676_v6, %v171_v20  ;;  %v290_v16 = vand.u32 127, %v289_v8 }
  0x97   :  { %v126_v23 = vpop.f32.mrf.mxu0  ;;  %v135_v25 = vpop.f32.mrf.mxu2 }
  0x98   :  { %v149_v24 = vadd.f32 %v498_v15, %v126_v23  ;;  %v183_v26 = vadd.f32 %v182_v22, %v181_v21  ;;  %v132_v27 = vpop.f32.mrf.mxu1  ;;  %v152_v41 = vadd.f32 %v498_v15, %v135_v25  ;;  %v141_v49 = vpop.f32.mrf.mxu3  ;;  %vm291_vm1 = vcmp.lt.s32.totalorder %v290_v16, 32 }
  0x99   :  { %v151_v32 = vadd.f32 %v498_v15, %v132_v27  ;;  %v154_v57 = vadd.f32 %v498_v15, %v141_v49  ;;  %v724_v21 = vsel %vm291_vm1, %v281_v18, 0.0 }
  0x9a   :  { %v179_v29 = vmul.f32 %v680_v7, %v149_v24  ;;  %503 = vtanh.f32 %v183_v26  ;;  %v190_v36 = vmul.f32 %v676_v6, %v183_v26  ;;  %v206_v52 = vmul.f32 %v680_v7, %v152_v41 }
  0x9b   :  { %v197_v39 = vmul.f32 %v680_v7, %v151_v32  ;;  %v224_v63 = vmul.f32 %v680_v7, %v154_v57 }
  0x9c   :  { %v180_v31 = vadd.f32 %v179_v29, %v178_v28 }
  0x9e   :  { %v191_v33 = vmul.f32 %v680_v7, %v180_v31  ;;  %v187_v34 = vmul.f32 %v676_v6, %v180_v31 }
  0x9f   :  { %v138_v42 = vpop.f32.mrf.mxu2 }
  0xa0   :  { %v701_v37 = vpop.eup %503  ;;  %v189_v38 = vadd.f32 %v188_v35, %v187_v34  ;;  %v192_v40 = vadd.f32 %v191_v33, %v190_v36  ;;  %v153_v47 = vadd.f32 %v498_v15, %v138_v42  ;;  %v78_v35 = vld [vmem:[#allocation5 + $0x38] sm:$0xff] }
  0xa1   :  { %259 = vadd.xlane.f32.xlu0 %v701_v37  ;;  %483 = vmatmul.msk.f32.gmra.mxu3 %vm81_vm0, %v78_v35 }
  0xa2   :  { %v200_v43 = vmul.f32 %v680_v7, %v189_v38  ;;  %v196_v44 = vmul.f32 %v676_v6, %v189_v38  ;;  %505 = vtanh.f32 %v192_v40  ;;  %v199_v45 = vmul.f32 %v676_v6, %v192_v40 }
  0xa3   :  { %v215_v56 = vmul.f32 %v680_v7, %v153_v47 }
  0xa4   :  { %v198_v46 = vadd.f32 %v197_v39, %v196_v44  ;;  %v201_v48 = vadd.f32 %v200_v43, %v199_v45 }
  0xa6   :  { %v209_v50 = vmul.f32 %v680_v7, %v198_v46  ;;  %v205_v51 = vmul.f32 %v676_v6, %v198_v46  ;;  %v208_v53 = vmul.f32 %v676_v6, %v201_v48  ;;  %507 = vtanh.f32 %v201_v48 }
  0xa8   :  { %v506_v54 = vpop.eup %505  ;;  %v207_v55 = vadd.f32 %v206_v52, %v205_v51  ;;  %v210_v58 = vadd.f32 %v209_v50, %v208_v53 }
  0xa9   :  { %261 = vadd.xlane.f32.xlu1 %v506_v54 }
  0xaa   :  { %v218_v59 = vmul.f32 %v680_v7, %v207_v55  ;;  %v214_v60 = vmul.f32 %v676_v6, %v207_v55  ;;  %509 = vtanh.f32 %v210_v58  ;;  %v217_v61 = vmul.f32 %v676_v6, %v210_v58 }
  0xac   :  { %v216_v62 = vadd.f32 %v215_v56, %v214_v60  ;;  %v219_v0 = vadd.f32 %v218_v59, %v217_v61  ;;  %v508_v4 = vpop.eup %507 }
  0xae   :  { %v227_v1 = vmul.f32 %v680_v7, %v216_v62  ;;  %v223_v2 = vmul.f32 %v676_v6, %v216_v62  ;;  %v226_v3 = vmul.f32 %v676_v6, %v219_v0  ;;  %511 = vtanh.f32 %v219_v0 }
  0xb0   :  { %v510_v9 = vpop.eup %509  ;;  %v225_v10 = vadd.f32 %v224_v63, %v223_v2  ;;  %v228_v11 = vadd.f32 %v227_v1, %v226_v3  ;;  %v765_v2 = vld [vmem:[#allocation10 + $0x3] ss:$0 sm:$0xff] }
  0xb1   :  { %263 = vadd.xlane.f32.xlu1 %v508_v4  ;;  %265 = vadd.xlane.f32.xlu2 %v510_v9 }
  0xb2   :  { %v236_v12 = vmul.f32 %v680_v7, %v225_v10  ;;  %513 = vtanh.f32 %v228_v11  ;;  %v235_v15 = vmul.f32 %v676_v6, %v228_v11  ;;  %v302_v7 = vmul.f32 %v724_v21, %v724_v21 }
  0xb4   :  { %v237_v17 = vadd.f32 %v236_v12, %v235_v15  ;;  %v512_v19 = vpop.eup %511 }
  0xb6   :  { %515 = vtanh.f32 %v237_v17 }
  0xb8   :  { %v514_v20 = vpop.eup %513 }
  0xb9   :  { %267 = vadd.xlane.f32.xlu2 %v512_v19  ;;  %269 = vadd.xlane.f32.xlu0 %v514_v20 }
  0xbc   :  { %v516_v22 = vpop.eup %515 }
  0xbd   :  { %271 = vadd.xlane.f32.xlu1 %v516_v22 }
  0xc1   :  { %310 = vadd.xlane.f32.xlu2 %v302_v7 }
 0x114   :  { %v260_v6 = vpop.xlane.xlu0 %259 }
 0x115   :  { %v274_v23 = vmul.f32 0.03125, %v260_v6 }
 0x117   :  { %v282_v24 = vsub.f32 %v701_v37, %v274_v23 }
 0x119   :  { %v730_v14 = vsel %vm291_vm1, %v282_v24, 0.0 }
 0x11a   :  { %v303_v25 = vmul.f32 %v730_v14, %v730_v14 }
 0x11c   :  { %v262_v26 = vpop.xlane.xlu1 %261  ;;  %312 = vadd.xlane.f32.xlu0 %v303_v25 }
 0x11d   :  { %v275_v27 = vmul.f32 0.03125, %v262_v26 }
 0x11f   :  { %v283_v28 = vsub.f32 %v506_v54, %v275_v27 }
 0x121   :  { %v735_v29 = vsel %vm291_vm1, %v283_v28, 0.0 }
 0x122   :  { %v304_v30 = vmul.f32 %v735_v29, %v735_v29 }
 0x124   :  { %v264_v31 = vpop.xlane.xlu1 %263  ;;  %v266_v32 = vpop.xlane.xlu2 %265  ;;  %314 = vadd.xlane.f32.xlu1 %v304_v30 }
 0x125   :  { %v276_v33 = vmul.f32 0.03125, %v264_v31  ;;  %v277_v34 = vmul.f32 0.03125, %v266_v32 }
 0x127   :  { %v284_v36 = vsub.f32 %v508_v4, %v276_v33  ;;  %v285_v37 = vsub.f32 %v510_v9, %v277_v34  ;;  %v767_v4 = vld [vmem:[#allocation10 + $0x4] ss:$0 sm:$0xff] }
 0x129   :  { %v741_v38 = vsel %vm291_vm1, %v284_v36, 0.0  ;;  %v744_v39 = vsel %vm291_vm1, %v285_v37, 0.0 }
 0x12a   :  { %v305_v40 = vmul.f32 %v741_v38, %v741_v38  ;;  %v306_v41 = vmul.f32 %v744_v39, %v744_v39 }
 0x12c   :  { %316 = vadd.xlane.f32.xlu2 %v305_v40  ;;  %v268_v42 = vpop.xlane.xlu2 %267  ;;  %318 = vadd.xlane.f32.xlu0 %v306_v41  ;;  %v270_v43 = vpop.xlane.xlu0 %269 }
 0x12d   :  { %v278_v44 = vmul.f32 0.03125, %v268_v42  ;;  %v279_v45 = vmul.f32 0.03125, %v270_v43  ;;  %v144_v42 = vpop.f32.mrf.mxu3 }
 0x12f   :  { %v286_v46 = vsub.f32 %v512_v19, %v278_v44  ;;  %v287_v47 = vsub.f32 %v514_v20, %v279_v45 }
 0x130   :  { %v272_v48 = vpop.xlane.xlu1 %271 }
 0x131   :  { %v280_v49 = vmul.f32 0.03125, %v272_v48  ;;  %v751_v50 = vsel %vm291_vm1, %v287_v47, 0.0  ;;  %v754_v51 = vsel %vm291_vm1, %v286_v46, 0.0 }
 0x132   :  { %v308_v52 = vmul.f32 %v751_v50, %v751_v50  ;;  %v307_v53 = vmul.f32 %v754_v51, %v754_v51 }
 0x133   :  { %v288_v54 = vsub.f32 %v516_v22, %v280_v49 }
 0x134   :  { %v311_v55 = vpop.xlane.xlu2 %310  ;;  %322 = vadd.xlane.f32.xlu2 %v308_v52  ;;  %320 = vadd.xlane.f32.xlu1 %v307_v53 }
 0x135   :  { %v326_v56 = vmul.f32 0.03125, %v311_v55  ;;  %v761_v57 = vsel %vm291_vm1, %v288_v54, 0.0 }
 0x136   :  { %v309_v58 = vmul.f32 %v761_v57, %v761_v57 }
 0x137   :  { %v334_v59 = vadd.f32 1e-05, %v326_v56 }
 0x138   :  { %324 = vadd.xlane.f32.xlu0 %v309_v58 }
 0x139   :  { %517 = vrsqrt.f32 %v334_v59  ;;  %vm348_vm2 = vweird.f32 %v334_v59 }
 0x13f   :  { %v518_v60 = vpop.eup %517 }
 0x140   :  { %v343_v61 = vmul.f32 %v518_v60, %v334_v59  ;;  %vm349_vm3 = vweird.f32 %v518_v60 }
 0x141   :  { %vm350_vm4 = vmor %vm348_vm2, %vm349_vm3 }
 0x142   :  { %v344_v62 = vmul.f32 %v518_v60, %v343_v61 }
 0x144   :  { %v345_v63 = vmul.f32 0.5, %v344_v62 }
 0x146   :  { %v346_v0 = vsub.f32 1.5, %v345_v63 }
 0x148   :  { %v347_v1 = vmul.f32 %v518_v60, %v346_v0 }
 0x14a   :  { %v351_v3 = vsel %vm350_vm4, %v518_v60, %v347_v1 }
 0x14b   :  { %v422_v5 = vmul.f32 %v351_v3, %v724_v21 }
 0x14d   :  { %v431_v8 = vmul.f32 %v765_v2, %v422_v5 }
 0x14f   :  { %v440_v9 = vadd.f32 %v767_v4, %v431_v8 }
 0x151   :  { %448 = vst [vmem:[#allocation11] sm:$0xff] %v440_v9 }
 0x18f   :  { %v313_v10 = vpop.xlane.xlu0 %312 }
 0x190   :  { %v327_v11 = vmul.f32 0.03125, %v313_v10 }
 0x192   :  { %v335_v12 = vadd.f32 1e-05, %v327_v11 }
 0x194   :  { %519 = vrsqrt.f32 %v335_v12  ;;  %vm358_vm6 = vweird.f32 %v335_v12 }
 0x197   :  { %v315_v13 = vpop.xlane.xlu1 %314 }
 0x198   :  { %v328_v15 = vmul.f32 0.03125, %v315_v13 }
 0x19a   :  { %v520_v16 = vpop.eup %519  ;;  %v336_v17 = vadd.f32 1e-05, %v328_v15 }
 0x19b   :  { %v353_v18 = vmul.f32 %v520_v16, %v335_v12  ;;  %vm359_vm5 = vweird.f32 %v520_v16 }
 0x19c   :  { %521 = vrsqrt.f32 %v336_v17  ;;  %vm360_vm7 = vmor %vm358_vm6, %vm359_vm5  ;;  %vm368_vm9 = vweird.f32 %v336_v17 }
 0x19d   :  { %v354_v19 = vmul.f32 %v520_v16, %v353_v18 }
 0x19f   :  { %v355_v20 = vmul.f32 0.5, %v354_v19  ;;  %v317_v22 = vpop.xlane.xlu2 %316  ;;  %v319_v7 = vpop.xlane.xlu0 %318 }
 0x1a0   :  { %v329_v21 = vmul.f32 0.03125, %v317_v22  ;;  %v330_v6 = vmul.f32 0.03125, %v319_v7 }
 0x1a1   :  { %v356_v23 = vsub.f32 1.5, %v355_v20 }
 0x1a2   :  { %v522_v24 = vpop.eup %521  ;;  %v337_v25 = vadd.f32 1e-05, %v329_v21  ;;  %v338_v26 = vadd.f32 1e-05, %v330_v6 }
 0x1a3   :  { %v357_v27 = vmul.f32 %v520_v16, %v356_v23  ;;  %v363_v28 = vmul.f32 %v522_v24, %v336_v17  ;;  %vm369_vm8 = vweird.f32 %v522_v24 }
 0x1a4   :  { %523 = vrsqrt.f32 %v337_v25  ;;  %vm370_vm10 = vmor %vm368_vm9, %vm369_vm8  ;;  %vm378_vm13 = vweird.f32 %v337_v25  ;;  %vm388_vm15 = vweird.f32 %v338_v26 }
 0x1a5   :  { %v361_v30 = vsel %vm360_vm7, %v520_v16, %v357_v27  ;;  %v364_v31 = vmul.f32 %v522_v24, %v363_v28  ;;  %525 = vrsqrt.f32 %v338_v26 }
 0x1a6   :  { %v423_v32 = vmul.f32 %v361_v30, %v730_v14 }
 0x1a7   :  { %v365_v33 = vmul.f32 0.5, %v364_v31  ;;  %v323_v34 = vpop.xlane.xlu2 %322  ;;  %v321_v35 = vpop.xlane.xlu1 %320 }
 0x1a8   :  { %v432_v36 = vmul.f32 %v765_v2, %v423_v32  ;;  %v332_v37 = vmul.f32 0.03125, %v323_v34  ;;  %v331_v40 = vmul.f32 0.03125, %v321_v35 }
 0x1a9   :  { %v366_v41 = vsub.f32 1.5, %v365_v33 }
 0x1aa   :  { %v524_v43 = vpop.eup %523  ;;  %v441_v44 = vadd.f32 %v767_v4, %v432_v36  ;;  %v340_v45 = vadd.f32 1e-05, %v332_v37  ;;  %v775_v46 = vadd.f32 1e-05, %v331_v40 }
 0x1ab   :  { %v526_v47 = vpop.eup %525  ;;  %v367_v48 = vmul.f32 %v522_v24, %v366_v41  ;;  %v373_v14 = vmul.f32 %v524_v43, %v337_v25  ;;  %v325_v49 = vpop.xlane.xlu0 %324  ;;  %vm379_vm11 = vweird.f32 %v524_v43 }
 0x1ac   :  { %449 = vst [vmem:[#allocation11 + $0x8] sm:$0xff] %v441_v44  ;;  %v383_v52 = vmul.f32 %v526_v47, %v338_v26  ;;  %527 = vrsqrt.f32 %v340_v45  ;;  %v333_v58 = vmul.f32 0.03125, %v325_v49  ;;  %vm389_vm12 = vweird.f32 %v526_v47  ;;  %vm380_vm14 = vmor %vm378_vm13, %vm379_vm11 }
 0x1ad   :  { %v371_v53 = vsel %vm370_vm10, %v522_v24, %v367_v48  ;;  %v374_v54 = vmul.f32 %v524_v43, %v373_v14  ;;  %529 = vrsqrt.f32 %v775_v46  ;;  %vm390_vm0 = vmor %vm388_vm15, %vm389_vm12  ;;  %vm408_vm3 = vweird.f32 %v340_v45 }
 0x1ae   :  { %v424_v55 = vmul.f32 %v371_v53, %v735_v29  ;;  %v384_v56 = vmul.f32 %v526_v47, %v383_v52  ;;  %v341_v62 = vadd.f32 1e-05, %v333_v58  ;;  %vm398_vm5 = vweird.f32 %v775_v46 }
 0x1af   :  { %v375_v59 = vmul.f32 0.5, %v374_v54 }
 0x1b0   :  { %v433_v60 = vmul.f32 %v765_v2, %v424_v55  ;;  %v385_v61 = vmul.f32 0.5, %v384_v56  ;;  %531 = vrsqrt.f32 %v341_v62  ;;  %vm418_vm8 = vweird.f32 %v341_v62 }
 0x1b1   :  { %v376_v63 = vsub.f32 1.5, %v375_v59 }
 0x1b2   :  { %v528_v0 = vpop.eup %527  ;;  %v442_v1 = vadd.f32 %v767_v4, %v433_v60  ;;  %v386_v3 = vsub.f32 1.5, %v385_v61 }
 0x1b3   :  { %v530_v5 = vpop.eup %529  ;;  %v377_v8 = vmul.f32 %v524_v43, %v376_v63  ;;  %v403_v9 = vmul.f32 %v528_v0, %v340_v45  ;;  %vm409_vm1 = vweird.f32 %v528_v0 }
 0x1b4   :  { %450 = vst [vmem:[#allocation11 + $0x10] sm:$0xff] %v442_v1  ;;  %v387_v29 = vmul.f32 %v526_v47, %v386_v3  ;;  %v393_v10 = vmul.f32 %v530_v5, %v775_v46  ;;  %vm399_vm2 = vweird.f32 %v530_v5  ;;  %vm410_vm4 = vmor %vm408_vm3, %vm409_vm1 }
 0x1b5   :  { %v381_v11 = vsel %vm380_vm14, %v524_v43, %v377_v8  ;;  %v404_v12 = vmul.f32 %v528_v0, %v403_v9  ;;  %vm400_vm6 = vmor %vm398_vm5, %vm399_vm2 }
 0x1b6   :  { %v425_v13 = vmul.f32 %v381_v11, %v741_v38  ;;  %v391_v15 = vsel %vm390_vm0, %v526_v47, %v387_v29  ;;  %v394_v16 = vmul.f32 %v530_v5, %v393_v10  ;;  %v532_v19 = vpop.eup %531 }
 0x1b7   :  { %v426_v17 = vmul.f32 %v391_v15, %v744_v39  ;;  %v405_v18 = vmul.f32 0.5, %v404_v12  ;;  %v413_v6 = vmul.f32 %v532_v19, %v341_v62  ;;  %vm419_vm7 = vweird.f32 %v532_v19 }
 0x1b8   :  { %v434_v20 = vmul.f32 %v765_v2, %v425_v13  ;;  %v395_v22 = vmul.f32 0.5, %v394_v16  ;;  %vm420_vm9 = vmor %vm418_vm8, %vm419_vm7 }
 0x1b9   :  { %v435_v7 = vmul.f32 %v765_v2, %v426_v17  ;;  %v406_v21 = vsub.f32 1.5, %v405_v18  ;;  %v414_v26 = vmul.f32 %v532_v19, %v413_v6 }
 0x1ba   :  { %v443_v23 = vadd.f32 %v767_v4, %v434_v20  ;;  %v396_v24 = vsub.f32 1.5, %v395_v22 }
 0x1bb   :  { %v444_v38 = vadd.f32 %v767_v4, %v435_v7  ;;  %v407_v25 = vmul.f32 %v528_v0, %v406_v21  ;;  %v415_v28 = vmul.f32 0.5, %v414_v26 }
 0x1bc   :  { %451 = vst [vmem:[#allocation11 + $0x18] sm:$0xff] %v443_v23  ;;  %v397_v39 = vmul.f32 %v530_v5, %v396_v24 }
 0x1bd   :  { %452 = vst [vmem:[#allocation11 + $0x20] sm:$0xff] %v444_v38  ;;  %v411_v27 = vsel %vm410_vm4, %v528_v0, %v407_v25  ;;  %v416_v33 = vsub.f32 1.5, %v415_v28 }
 0x1be   :  { %v428_v30 = vmul.f32 %v411_v27, %v751_v50  ;;  %v401_v31 = vsel %vm400_vm6, %v530_v5, %v397_v39 }
 0x1bf   :  { %v427_v32 = vmul.f32 %v401_v31, %v754_v51  ;;  %v417_v36 = vmul.f32 %v532_v19, %v416_v33 }
 0x1c0   :  { %v437_v34 = vmul.f32 %v765_v2, %v428_v30 }
 0x1c1   :  { %v436_v35 = vmul.f32 %v765_v2, %v427_v32  ;;  %v421_v41 = vsel %vm420_vm9, %v532_v19, %v417_v36 }
 0x1c2   :  { %v446_v37 = vadd.f32 %v767_v4, %v437_v34  ;;  %v429_v50 = vmul.f32 %v421_v41, %v761_v57 }
 0x1c3   :  { %v445_v40 = vadd.f32 %v767_v4, %v436_v35 }
 0x1c4   :  { %454 = vst [vmem:[#allocation11 + $0x30] sm:$0xff] %v446_v37  ;;  %v438_v51 = vmul.f32 %v765_v2, %v429_v50 }
 0x1c5   :  { %453 = vst [vmem:[#allocation11 + $0x28] sm:$0xff] %v445_v40 }
 0x1c6   :  { %v447_v42 = vadd.f32 %v767_v4, %v438_v51 }
 0x1c8   :  { %455 = vst [vmem:[#allocation11 + $0x38] sm:$0xff] %v447_v42 }
 0x1c9   :  { %468 = dma.vmem_to_hbm [thread:$0]  %s461_s27, 1024, %s463_s30, [#allocation7], %s636_s20, %s636_s20, %s637_s21  }
 0x1ca   :  { %633 = dma.done.wait [#allocation7], 1024  }
 0x1cb   :  { %634 = vsyncadd [#allocation7], 4294966272 }
 0x1cc   :  { %473 = vsyncpa [#allocation6], 1 }
 0x1cd   :  { %474 = vsyncpa [#allocation9], 1 }
 0x1ce   :  { %475 = vsyncpa [#allocation7], 1 }

</bundles_post_ra>
